<compile_context>
chip_gen: v7x
topology: tpu7x:2x2x1
jax: 0.10.0
libtpu: 0.0.40
codegen_flags: <defaults>
</compile_context>

<pallas_src>
import functools

import numpy as np
import jax
import jax.numpy as jnp
from jax import lax
from jax.experimental import pallas as pl
from jax.experimental.pallas import tpu as pltpu


def tok_kernel(x_ref, ids_s_ref, ids_l_ref, mask_ref, w_ref, b_ref, tok_ref):
    # x_ref:     (1, S, D)  last_hidden_states row (native dtype)
    # ids_s_ref: (1, S, 1)  int32 ids, sublane-major
    # ids_l_ref: (1, 1, S)  int32 ids, lane-major
    # mask_ref:  (1, 1, S)  f32 attention mask
    # w_ref:     (1, D)     linear weight (same dtype as x)
    # b_ref:     (1, 1)     f32 bias
    # tok_ref:   (1, 1, S)  f32 out: tok_weights with "last write wins" folded in
    S = x_ref.shape[1]

    x = x_ref[0]                                   # (S, D)
    w = w_ref[...]                                 # (1, D)
    logits = jax.lax.dot_general(
        w, x, (((1,), (1,)), ((), ())),
        preferred_element_type=jnp.float32)        # (1, S), f32 accumulation
    logits = logits + b_ref[...]
    tok = jnp.log1p(jnp.maximum(logits, 0.0)) * mask_ref[0]   # (1, S)

    # Last-write-wins for duplicated ids: zero every position whose id occurs
    # again later in the row (the later position's value is the one that
    # survives PyTorch's advanced-index assignment).
    ids_s = ids_s_ref[0]                           # (S, 1)
    ids_l = ids_l_ref[0]                           # (1, S)
    eq = ids_s == ids_l                            # eq[s2, s] = ids[s2] == ids[s]
    later = (jax.lax.broadcasted_iota(jnp.int32, (S, S), 0)
             > jax.lax.broadcasted_iota(jnp.int32, (S, S), 1))   # s2 > s
    dup_later = jnp.max(jnp.where(eq & later, 1.0, 0.0),
                        axis=0, keepdims=True)     # (1, S) in {0, 1}
    tok_ref[0] = tok * (1.0 - dup_later)


def scatter_kernel(ids_s_ref, tok_ref, out_ref, *, chunk):
    # ids_s_ref: (1, S, 1) int32; tok_ref: (1, 1, S) f32; out_ref: (1, 1, TV) f32
    j = pl.program_id(1)
    S = ids_s_ref.shape[1]
    TV = out_ref.shape[2]
    n_chunks = TV // chunk

    ids_local = ids_s_ref[0] - j * TV              # (S, 1) ids relative to tile start
    tok = tok_ref[0]                               # (1, S) f32

    # Hoisted once per grid step (JAX does not CSE broadcast_in_dim).
    base_iota = jax.lax.broadcasted_iota(jnp.int32, (S, chunk), 1)

    def body(c, carry):
        start = pl.multiple_of(c * chunk, 128)
        # Shift the (S,1) ids instead of rebuilding the (S,chunk) iota per chunk.
        onehot = ((ids_local - c * chunk) == base_iota).astype(jnp.float32)   # (S, chunk)
        # At most one nonzero per column (last-write-wins already folded in),
        # so the f32 MXU sum is exact.
        res = jnp.dot(tok, onehot, preferred_element_type=jnp.float32)        # (1, chunk)
        out_ref[0, :, pl.ds(start, chunk)] = res   # unmasked lane-dense store
        return carry

    lax.fori_loop(0, n_chunks, body, 0, unroll=min(4, n_chunks))


def mlp_forward(last_hidden_states, input_ids, attention_mask, weight, bias,
                vocab_size, *, vocab_tile=16384, vocab_chunk=256):
    B, S, D = last_hidden_states.shape
    assert vocab_tile % vocab_chunk == 0
    assert vocab_chunk % 128 == 0
    # NOTE: input_ids outside [0, vocab_size) are silently dropped by the kernel
    # (PyTorch's indexed assignment would raise instead).

    x = last_hidden_states                          # native dtype, no upcast
    ids_s = input_ids.astype(jnp.int32).reshape(B, S, 1)
    ids_l = input_ids.astype(jnp.int32).reshape(B, 1, S)
    mask3 = attention_mask.astype(jnp.float32).reshape(B, 1, S)
    w2 = weight.reshape(1, D).astype(x.dtype)
    b2 = bias.reshape(1, 1).astype(jnp.float32)

    # Pass 1: token weights per batch row (with last-write-wins folded in).
    tok = pl.pallas_call(
        tok_kernel,
        out_shape=jax.ShapeDtypeStruct((B, 1, S), jnp.float32),
        grid=(B,),
        in_specs=[
            pl.BlockSpec((1, S, D), lambda i: (i, 0, 0)),
            pl.BlockSpec((1, S, 1), lambda i: (i, 0, 0)),
            pl.BlockSpec((1, 1, S), lambda i: (i, 0, 0)),
            pl.BlockSpec((1, 1, S), lambda i: (i, 0, 0)),
            pl.BlockSpec((1, D), lambda i: (0, 0)),
            pl.BlockSpec((1, 1), lambda i: (0, 0)),
        ],
        out_specs=pl.BlockSpec((1, 1, S), lambda i: (i, 0, 0)),
        compiler_params=pltpu.CompilerParams(
            dimension_semantics=("parallel",)),
    )(x, ids_s, ids_l, mask3, w2, b2)

    # Pass 2: pure scatter over the (padded) vocab.  Few, large tiles per row;
    # the per-chunk work loops inside the kernel.  Both grid axes parallel.
    V = vocab_size
    chunk = vocab_chunk
    v_chunks = pl.cdiv(V, chunk)                    # 256-wide chunks needed to cover V
    max_chunks = max(1, vocab_tile // chunk)
    n_tiles = pl.cdiv(v_chunks, max_chunks)
    chunks_per_tile = pl.cdiv(v_chunks, n_tiles)    # rebalance so padding stays minimal
    TV = chunks_per_tile * chunk
    V_pad = n_tiles * TV                            # padded cols never match an id < V

    out = pl.pallas_call(
        functools.partial(scatter_kernel, chunk=chunk),
        out_shape=jax.ShapeDtypeStruct((B, 1, V_pad), jnp.float32),
        grid=(B, n_tiles),
        in_specs=[
            pl.BlockSpec((1, S, 1), lambda i, j: (i, 0, 0)),
            pl.BlockSpec((1, 1, S), lambda i, j: (i, 0, 0)),
        ],
        out_specs=pl.BlockSpec((1, 1, TV), lambda i, j: (i, 0, j)),
        compiler_params=pltpu.CompilerParams(
            dimension_semantics=("parallel", "parallel")),
    )(ids_s, tok)

    out = out.reshape(B, V_pad)
    return out[:, :V] if V_pad != V else out


def ref_forward(lhs, ids, mask, weight, bias, vocab_size):
    """NumPy reference mirroring the PyTorch forward (sequential scatter => last wins)."""
    lhs = np.asarray(lhs, np.float32)
    ids = np.asarray(ids)
    mask = np.asarray(mask, np.float32)
    w = np.asarray(weight, np.float32).reshape(-1)
    b = float(np.asarray(bias).reshape(()))
    B, S, _ = lhs.shape
    logits = lhs @ w + b                              # (B, S)
    tok = np.log1p(np.maximum(logits, 0.0)) * mask    # (B, S)
    out = np.zeros((B, vocab_size), np.float32)
    for bi in range(B):
        for s in range(S):
            out[bi, int(ids[bi, s])] = tok[bi, s]
    return out


if __name__ == "__main__":
    B, S, D, V = 2, 8, 32, 512   # small shapes (module uses seq=77, CLIP vocab=49408)

    key = jax.random.PRNGKey(0)
    k_x, k_ids, k_w, k_b = jax.random.split(key, 4)

    last_hidden_states = jax.random.normal(k_x, (B, S, D), dtype=jnp.float32)
    input_ids = jax.random.randint(k_ids, (B, S), 0, V, dtype=jnp.int32)
    # Force duplicate ids to exercise the last-write-wins path
    # (including a duplicate whose last occurrence is a masked position).
    input_ids = input_ids.at[0, 1].set(input_ids[0, 5])
    input_ids = input_ids.at[1, 7].set(input_ids[1, 2])
    attention_mask = jnp.concatenate(
        [jnp.ones((B, S - 2), jnp.float32), jnp.zeros((B, 2), jnp.float32)], axis=1)

    # nn.Linear(D, 1) with kaiming_normal_(nonlinearity='relu'): std = sqrt(2 / fan_in)
    weight = jax.random.normal(k_w, (1, D), dtype=jnp.float32) * jnp.sqrt(2.0 / D)
    # default nn.Linear bias init: U(-1/sqrt(fan_in), 1/sqrt(fan_in))
    bound = 1.0 / jnp.sqrt(jnp.float32(D))
    bias = jax.random.uniform(k_b, (1,), jnp.float32, -bound, bound)

    lex_weights = mlp_forward(last_hidden_states, input_ids, attention_mask,
                              weight, bias, V)
    lex_weights = jax.block_until_ready(lex_weights)

    expected = ref_forward(last_hidden_states, input_ids, attention_mask, weight, bias, V)
    np.testing.assert_allclose(np.asarray(lex_weights), expected, rtol=1e-5, atol=1e-5)

    print("KERNEL_OK")
</pallas_src>

<mosaic_0001>
module attributes {stable_mosaic.version = 11 : i64} {
  func.func @tok_kernel(%arg0: i32, %arg1: memref<1x8x32xf32, #tpu.memory_space<vmem>>, %arg2: memref<1x8x1xi32, #tpu.memory_space<vmem>>, %arg3: memref<1x1x8xi32, #tpu.memory_space<vmem>>, %arg4: memref<1x1x8xf32, #tpu.memory_space<vmem>>, %arg5: memref<1x32xf32, #tpu.memory_space<vmem>>, %arg6: memref<1x1xf32, #tpu.memory_space<vmem>>, %arg7: memref<1x1x8xf32, #tpu.memory_space<vmem>>) attributes {dimension_semantics = [#tpu.dimension_semantics<parallel>], iteration_bounds = array<i64: 2>, scalar_prefetch = 0 : i64, scratch_operands = 0 : i64, tpu.core_type = #tpu.core_type<tc>, window_params = [{transform_indices = @transform_0, window_bounds = array<i64: 1, 8, 32>}, {transform_indices = @transform_1, window_bounds = array<i64: 1, 8, 1>}, {transform_indices = @transform_2, window_bounds = array<i64: 1, 1, 8>}, {transform_indices = @transform_3, window_bounds = array<i64: 1, 1, 8>}, {pipeline_mode = #tpu.pipeline_mode<synchronous>, transform_indices = @transform_4, window_bounds = array<i64: 1, 32>}, {pipeline_mode = #tpu.pipeline_mode<synchronous>, transform_indices = @transform_5, window_bounds = array<i64: 1, 1>}, {transform_indices = @transform_6, window_bounds = array<i64: 1, 1, 8>}]} {
    %c0 = arith.constant 0 : index
    %c0_0 = arith.constant 0 : index
    %c0_1 = arith.constant 0 : index
    %0 = vector.load %arg1[%c0, %c0_0, %c0_1] : memref<1x8x32xf32, #tpu.memory_space<vmem>>, vector<1x8x32xf32>
    %1 = vector.shape_cast %0 : vector<1x8x32xf32> to vector<8x32xf32>
    %c0_2 = arith.constant 0 : index
    %c0_3 = arith.constant 0 : index
    %2 = vector.load %arg5[%c0_2, %c0_3] : memref<1x32xf32, #tpu.memory_space<vmem>>, vector<1x32xf32>
    %cst = arith.constant dense<0.000000e+00> : vector<1x8xf32>
    %3 = tpu.matmul %2, %1, %cst {dimension_numbers = #tpu.dot_dimension_numbers<[1], [1], [0], [0], [0, 0, 1, 0], [], []>} : vector<1x32xf32>, vector<8x32xf32>, vector<1x8xf32> -> vector<1x8xf32>
    %c0_4 = arith.constant 0 : index
    %c0_5 = arith.constant 0 : index
    %4 = vector.load %arg6[%c0_4, %c0_5] : memref<1x1xf32, #tpu.memory_space<vmem>>, vector<1x1xf32>
    %5 = vector.broadcast %4 : vector<1x1xf32> to vector<1x8xf32>
    %6 = arith.addf %3, %5 : vector<1x8xf32>
    %cst_6 = arith.constant 0.000000e+00 : f32
    %7 = vector.broadcast %cst_6 : f32 to vector<1x8xf32>
    %8 = arith.maximumf %6, %7 : vector<1x8xf32>
    %9 = math.log1p %8 : vector<1x8xf32>
    %c0_7 = arith.constant 0 : index
    %c0_8 = arith.constant 0 : index
    %c0_9 = arith.constant 0 : index
    %10 = vector.load %arg4[%c0_7, %c0_8, %c0_9] : memref<1x1x8xf32, #tpu.memory_space<vmem>>, vector<1x1x8xf32>
    %11 = vector.shape_cast %10 : vector<1x1x8xf32> to vector<1x8xf32>
    %12 = arith.mulf %9, %11 : vector<1x8xf32>
    %c0_10 = arith.constant 0 : index
    %c0_11 = arith.constant 0 : index
    %c0_12 = arith.constant 0 : index
    %13 = vector.load %arg2[%c0_10, %c0_11, %c0_12] : memref<1x8x1xi32, #tpu.memory_space<vmem>>, vector<1x8x1xi32>
    %14 = vector.shape_cast %13 : vector<1x8x1xi32> to vector<8x1xi32>
    %c0_13 = arith.constant 0 : index
    %c0_14 = arith.constant 0 : index
    %c0_15 = arith.constant 0 : index
    %15 = vector.load %arg3[%c0_13, %c0_14, %c0_15] : memref<1x1x8xi32, #tpu.memory_space<vmem>>, vector<1x1x8xi32>
    %16 = vector.shape_cast %15 : vector<1x1x8xi32> to vector<1x8xi32>
    %17 = vector.broadcast %14 : vector<8x1xi32> to vector<8x8xi32>
    %18 = vector.broadcast %16 : vector<1x8xi32> to vector<8x8xi32>
    %19 = arith.cmpi eq, %17, %18 : vector<8x8xi32>
    %20 = tpu.iota {dimensions = array<i32: 0>} : vector<8x8xi32>
    %21 = tpu.iota {dimensions = array<i32: 1>} : vector<8x8xi32>
    %22 = arith.cmpi sgt, %20, %21 : vector<8x8xi32>
    %23 = arith.andi %19, %22 : vector<8x8xi1>
    %cst_16 = arith.constant 1.000000e+00 : f32
    %cst_17 = arith.constant 0.000000e+00 : f32
    %24 = vector.broadcast %cst_16 : f32 to vector<8x8xf32>
    %25 = vector.broadcast %cst_17 : f32 to vector<8x8xf32>
    %26 = arith.select %23, %24, %25 : vector<8x8xi1>, vector<8x8xf32>
    %cst_18 = arith.constant dense<0xFF800000> : vector<8xf32>
    %27 = vector.multi_reduction <maximumf>, %26, %cst_18 [0] : vector<8x8xf32> to vector<8xf32>
    %28 = vector.shape_cast %27 : vector<8xf32> to vector<1x8xf32>
    %cst_19 = arith.constant 1.000000e+00 : f32
    %29 = vector.broadcast %cst_19 : f32 to vector<1x8xf32>
    %30 = arith.subf %29, %28 : vector<1x8xf32>
    %31 = arith.mulf %12, %30 : vector<1x8xf32>
    %c0_20 = arith.constant 0 : index
    %c0_21 = arith.constant 0 : index
    %c0_22 = arith.constant 0 : index
    %32 = vector.load %arg7[%c0_20, %c0_21, %c0_22] : memref<1x1x8xf32, #tpu.memory_space<vmem>>, vector<1x1x8xf32>
    %33 = vector.shape_cast %32 : vector<1x1x8xf32> to vector<1x8xf32>
    %34 = vector.shape_cast %31 : vector<1x8xf32> to vector<1x1x8xf32>
    tpu.vector_store %arg7[%c0_20, %c0_21, %c0_22], %34 {strides = array<i32>} : memref<1x1x8xf32, #tpu.memory_space<vmem>>, vector<1x1x8xf32>,
    return
  }
  func.func @transform_0(%arg0: i32) -> (i32, i32, i32) {
    %c0_i32 = arith.constant 0 : i32
    %c0_i32_0 = arith.constant 0 : i32
    %c0_i32_1 = arith.constant 0 : i32
    return %arg0, %c0_i32, %c0_i32_0 : i32, i32, i32
  }
  func.func @transform_1(%arg0: i32) -> (i32, i32, i32) {
    %c0_i32 = arith.constant 0 : i32
    %c0_i32_0 = arith.constant 0 : i32
    %c0_i32_1 = arith.constant 0 : i32
    return %arg0, %c0_i32, %c0_i32_0 : i32, i32, i32
  }
  func.func @transform_2(%arg0: i32) -> (i32, i32, i32) {
    %c0_i32 = arith.constant 0 : i32
    %c0_i32_0 = arith.constant 0 : i32
    %c0_i32_1 = arith.constant 0 : i32
    return %arg0, %c0_i32, %c0_i32_0 : i32, i32, i32
  }
  func.func @transform_3(%arg0: i32) -> (i32, i32, i32) {
    %c0_i32 = arith.constant 0 : i32
    %c0_i32_0 = arith.constant 0 : i32
    %c0_i32_1 = arith.constant 0 : i32
    return %arg0, %c0_i32, %c0_i32_0 : i32, i32, i32
  }
  func.func @transform_4(%arg0: i32) -> (i32, i32) {
    %c0_i32 = arith.constant 0 : i32
    %c0_i32_0 = arith.constant 0 : i32
    %c0_i32_1 = arith.constant 0 : i32
    return %c0_i32, %c0_i32_0 : i32, i32
  }
  func.func @transform_5(%arg0: i32) -> (i32, i32) {
    %c0_i32 = arith.constant 0 : i32
    %c0_i32_0 = arith.constant 0 : i32
    %c0_i32_1 = arith.constant 0 : i32
    return %c0_i32, %c0_i32_0 : i32, i32
  }
  func.func @transform_6(%arg0: i32) -> (i32, i32, i32) {
    %c0_i32 = arith.constant 0 : i32
    %c0_i32_0 = arith.constant 0 : i32
    %c0_i32_1 = arith.constant 0 : i32
    return %arg0, %c0_i32, %c0_i32_0 : i32, i32, i32
  }
}

</mosaic_0001>

<bundles_post_ra>
// kernel: tpu_custom_call.1
= control target key start
LH: loop header
LB: loop body
LE: loop exit
PB: predicated region body
PF: predicated region fallthrough
CT: control target
= control target key end

     0   :  { %s808_s0 = inlined_call_operand.vmem [shape: f32[2,8,32], index: 0, kind: input, shape index: {}]   ;;  %s809_s1 = inlined_call_operand.vmem [shape: s32[2,8,1], index: 1, kind: input, shape index: {}]   ;;  %s810_s2 = inlined_call_operand.vmem [shape: s32[2,1,8], index: 2, kind: input, shape index: {}]   ;;  %s811_s3 = inlined_call_operand.vmem [shape: f32[2,1,8], index: 3, kind: input, shape index: {}]   ;;  %s812_s4 = inlined_call_operand.vmem [shape: f32[1,32], index: 4, kind: input, shape index: {}]   ;;  %s813_s5 = inlined_call_operand.<no memory space> [shape: f32[1,1], index: 5, kind: input, shape index: {}]   ;;  %s814_s6 = inlined_call_operand.hbm [shape: f32[2,1,8], index: 6, kind: output, shape index: {}]  }
   0x1   :  { %v11_v0 = vstv %s813_s5 }
   0x2   :  { %12 = vst [vmem:[#allocation2] sm:$0x1] %v11_v0 }
   0x3   :  { %13 = vsyncpa [#allocation4], 0 }
   0x4   :  { %15 = vsyncpa [#allocation4 + $0x1], 0  ;;  %s691_s23 = smov 0   ;;  %s693_s24 = smov 0  }
   0x5   :  { %s695_s25 = smov 0   ;;  %s697_s26 = smov 0  }
   0x6 LB: > { %s712_s5 = sadd.s32 4294967295, %s647_s26   ;;  %s521_s27 = sadd.s32 4294967294, %s647_s26   ;;  %s647_s26 = sphi %s697_s26, %s820_s26   ;;  %s643_s25 = sphi %s695_s25, %s819_s25   ;;  %s639_s24 = sphi %s693_s24, %s818_s24   ;;  %s635_s23 = sphi %s691_s23, %s817_s23  }
   0x7   : > { %s716_s28 = sadd.s32 1, %s647_s26   ;;  %s174_s29 = sadd.s32 1, %s643_s25 }
   0x8   : > { %s171_s30 = ssub.s32 %s647_s26, %s716_s28  ;;  %p184_p0 = scmp.ne.s32.totalorder %s643_s25, %s639_s24 }
   0x9   : > { %p172_p1 = scmp.eq.s32.totalorder %s171_s30, 0  ;;  %p185_p2 = scmp.eq.s32.totalorder %s712_s5, 1 }
   0xa   : > { %p190_p3 = scmp.ne.s32.totalorder %s639_s24, %s635_s23  ;;  %p191_p4 = scmp.eq.s32.totalorder %s521_s27, 1 }
   0xb   : > { %s727_s7 = scalar_select %p172_p1, %s643_s25, %s174_s29  }
   0xc   : > { %p729_p5 = por %p185_p2, %p184_p0  ;;  %p733_p6 = por %p191_p4, %p190_p3 }
   0xd   : > { %p524_p7 = scmp.ge.s32.totalorder %s647_s26, 1  ;;  %p241_p8 = scmp.lt.s32.totalorder %s647_s26, 3 }
   0xf   : > { %p242_p9 = pnand %p524_p7, %p241_p8 }
  0x10   : > { %p279_p10 = scmp.lt.s32.totalorder (!%p242_p9), %s712_s5, 1  ;;  %v649_v1 = vmov (!%p242_p9), 0.0   ;;  %vm650_vm0 = vmmov (!%p242_p9), 0   ;;  %v295_v2 = vld [vmem:[#allocation2] sm:$0x1] (!%p242_p9)  ;;  %v651_v3 = vmov (!%p242_p9), 0   ;;  %v301_v8 = vlaneseq (!%p242_p9) }
  0x11   : > { %245 = sbr.rel (%p242_p9) target bundleno = 282 (0x11a), region = 44  ;;  %535 = vmatprep.subr.mxu0 (!%p242_p9), %v649_v1  ;;  %537 = vmatprep.mubr.msk.f32.mxu0 (!%p242_p9), %vm650_vm0, %v649_v1  ;;  %vm305_vm1 = vcmask (!%p242_p9), 261120   ;;  %v294_v6 = vld [vmem:[%s812_s4] sm:$0x1] (!%p242_p9)  ;;  %vm411_vm5 = vcmask (!%p242_p9), 64512   ;;  %s277_s27 = sand.u32 (!%p242_p9), 1, %s639_s24  }
  0x12   : > { %582 = vset.pattern.permute.xlu0 (!%p242_p9), %v651_v3  ;;  %v302_v9 = vshrl.u32 (!%p242_p9), %v301_v8, 7  ;;  %v407_v10 = vand.u32 (!%p242_p9), 127, %v301_v8  ;;  %s530_s12 = sshll.u32 (!%p242_p9), %s712_s5, 4  ;;  %s278_s13 = scalar_lea.vmem (!%p242_p9), [#allocation3], %s277_s27  ;;  %vm421_vm7 = vcmask (!%p242_p9), 57344  }
  0x13   : > { %298 = vperm.xlu0 (!%p242_p9), %582, %v295_v2  }
  0x14   : > { %vm408_vm2 = vcmp.gt.s32.totalorder (!%p242_p9), %v302_v9, %v407_v10  ;;  %v303_v14 = vsub.s32 (!%p242_p9), 0, %v302_v9 }
  0x18   : > { %s741_s10 = scalar_select %p279_p10, %s712_s5, 1 }
  0x19   : > { %s652_s5 = smov [#allocation3]  }
  0x1a   : > { %s525_s11 = sshll.u32 %s741_s10, 3  ;;  %s289_s22 = scalar_lea.vmem %s810_s2, %s741_s10 }
  0x1b   : > { %s282_s14 = scalar_lea.vmem %s808_s0, %s525_s11  ;;  %s286_s17 = scalar_lea.vmem %s809_s1, %s525_s11  ;;  %v529_v11 = vld [vmem:[%s289_s22] ss:$0 sm:$0xff] }
  0x1c   : > { %v293_v4 = vld [vmem:[%s282_s14] sm:$0xff]  ;;  %s292_s11 = scalar_lea.vmem %s811_s3, %s741_s10  ;;  %s436_s14 = sshll.u32 %s278_s13, 4  ;;  %s768_s14 = int_to_ptr.vmem [resolvable:$true] %s436_s14 }
  0x1d   : > { %v394_v5 = vld [vmem:[%s286_s17] sm:$0xff]  ;;  %536 = vmatpush3.xpose.msk.msra.mxu0 %vm305_vm1, %v293_v4  ;;  %s766_s17 = scalar_lea.hbm %s814_s6, %s530_s12  ;;  %s424_s10 = scalar_lea.sflag [#allocation4], %s277_s27 }
  0x1e   : > { %397 = vperm.xlu0 %582, %v394_v5   ;;  %v392_v34 = vld [vmem:[%s292_s11] sm:$0x1]  ;;  %s585_s18 = scalar_lea.vmem %s768_s14, 16  ;;  %s589_s19 = sshll.u32 %s652_s5, 4  ;;  %s590_s19 = int_to_ptr.vmem [resolvable:$false] %s589_s19 }
  0x1f   : > { %p586_p11 = scmp.ne.s32.totalorder %s768_s14, %s585_s18  ;;  %s591_s20 = scalar_lea.vmem %s590_s19, 32 }
  0x20   : > { %538 = vmatmul.mubr.msk.f32.vlgmr.msra.gmra.mrb[0].mxu0 %vm305_vm1, %v294_v6  ;;  %p592_p0 = scmp.lt.s32.totalorder %s768_s14, %s590_s19  ;;  %p593_p1 = scmp.lt.s32.totalorder %s591_s20, %s585_s18 }
  0x21   : > { %p587_p12 = pnand %p586_p11, %p729_p5 }
  0x22   : > { %p594_p2 = por %p593_p1, %p592_p0 }
  0x23   : > { %p588_p13 = pneg %p587_p12 }
  0x25   : > { %p595_p3 = pnand %p594_p2, %p588_p13 }
  0x92   : > { %v299_v7 = vpop.permute.xlu0 %298 }
  0x93   : > { %v304_v16 = vrot.slane %v299_v7, %v303_v14 }
  0x9d   : > { %v398_v12 = vpop.permute.xlu0 %397 }
  0x9e   : > { %vm403_vm3 = vcmp.eq.s32.totalorder %v398_v12, %v529_v11 }
  0x9f   : > { %vm409_vm4 = vmand %vm403_vm3, %vm408_vm2 }
  0xa0   : > { %v410_v13 = vsel %vm409_vm4, 1.0, %v649_v1 }
  0xa1   : > { %v412_v15 = vsel %vm411_vm5, %v410_v13, -inf }
  0xa2   : > { %v413_v17 = vrot.slane %v412_v15, 4 }
  0xa4   : > { %v414_v19 = vmax.f32 %v412_v15, %v413_v17 }
  0xa6   : > { %v415_v23 = vrot.slane %v414_v19, 2 }
  0xa8   : > { %v416_v25 = vmax.f32 %v414_v19, %v415_v23 }
  0xaa   : > { %v417_v27 = vrot.slane %v416_v25, 1 }
  0xac   : > { %v418_v31 = vmax.f32 %v416_v25, %v417_v27 }
  0xae   : > { %v419_v36 = vsub.f32 1.0, %v418_v31 }
  0xf3   : > { %v378_v18 = vpop.f32.mrb[0].mxu0 }
  0xf4   : > { %v379_v20 = vadd.f32 %v378_v18, %v304_v16  ;;  %v539_v21 = vpop.f32.mrb[1].mxu0 }
  0xf6   : > { %v382_v22 = vmax.f32 %v379_v20, 0.0 }
  0xf8   : > { %v383_v24 = vadd.f32 1.0, %v382_v22  ;;  %v386_v26 = vmul.f32 -0.5, %v382_v22  ;;  %v389_v29 = vand.u32 2147483647, %v382_v22 }
  0xfa   : > { %583 = vlog2.f32 %v383_v24  ;;  %v387_v28 = vadd.f32 1.0, %v386_v26  ;;  %vm390_vm6 = vcmp.lt.f32.partialorder %v389_v29, 0.0004427343 }
  0xfc   : > { %v388_v33 = vmul.f32 %v387_v28, %v382_v22 }
 0x104   : > { %v584_v30 = vpop.eup %583 }
 0x105   : > { %v385_v32 = vmul.f32 0.6931472, %v584_v30 }
 0x107   : > { %v391_v35 = vsel %vm390_vm6, %v388_v33, %v385_v32 }
 0x108   : > { %v393_v37 = vmul.f32 %v392_v34, %v391_v35 }
 0x10a   : > { %v420_v38 = vmul.f32 %v419_v36, %v393_v37 }
 0x10c   : > { %422 = vst.msk [vmem:[%s278_s13] sm:$0x1] %vm421_vm7, %v420_v38 }
 0x10d   : > { %598 = shalt.err (!%p595_p3)
}
 0x10e   : > { %s599_s21 = scalar_lea.hbm %s766_s17, 16  ;;  %s603_s29 = scalar_lea.hbm %s814_s6, 32 }
 0x10f   : > { %p600_p4 = scmp.ne.s32.totalorder %s766_s17, %s599_s21  ;;  %p604_p9 = scmp.lt.u32.totalorder %s766_s17, %s814_s6 }
 0x110   : > { %p605_p10 = scmp.lt.u32.totalorder %s603_s29, %s599_s21  ;;  %p607_p12 = scmp.lt.u32.totalorder %s599_s21, %s766_s17 }
 0x111   : > { %p601_p7 = pnand %p600_p4, %p729_p5 }
 0x112   : > { %p606_p11 = por %p605_p10, %p604_p9 }
 0x113   : > { %p602_p8 = pneg %p601_p7 }
 0x114   : > { %p608_p13 = por %p607_p12, %p606_p11 }
 0x116   : > { %p609_p0 = pnand %p608_p13, %p602_p8 }
 0x118   : > { %612 = shalt.err (!%p609_p0)
}
 0x119   : > { %540 = dma.vmem_to_hbm [thread:$0]  (%p729_p5), %s768_s14, 16, %s766_s17, %s424_s10  }
 0x11a PF: > { %p546_p1 = scmp.ge.s32.totalorder %s647_s26, 2  ;;  %s448_s12 = sand.u32 1, %s635_s23  }
 0x11b   : > { %s449_s13 = scalar_lea.sflag [#allocation4], %s448_s12 }
 0x11c   : > { %p543_p2 = pnand %p546_p1, %p733_p6 }
 0x11e   : > { %630 = dma.done.wait (!%p543_p2), %s449_s13, 16  }
 0x11f   : > { %632 = vsyncadd (!%p543_p2), %s449_s13, 4294967280  ;;  %p18_p3 = scmp.ge.s32.totalorder %s716_s28, 4   ;;  %s817_s23 = smov %s639_s24 }
 0x120   : > { %s818_s24 = smov %s643_s25  ;;  %s819_s25 = smov %s727_s7 }
 0x121   : > { %s820_s26 = smov %s716_s28  ;;  %20 = sbr.rel (!%p18_p3) target bundleno = 6 (0x6), region = 88 }
 0x128   :  { %453 = vsyncpa [#allocation4], 1 }
 0x129   :  { %455 = vsyncpa [#allocation4 + $0x1], 1 }

</bundles_post_ra>
